<compile_context>
chip_gen: v7x
topology: tpu7x:2x2x1
jax: 0.10.0
libtpu: 0.0.40
codegen_flags: <defaults>
</compile_context>

<pallas_src>
import jax
import jax.numpy as jnp
from jax import lax
from jax.experimental import pallas as pl
from jax.experimental.pallas import tpu as pltpu

# ---- static configuration ----
G_INSTANCES = 8     # independent graph-batches per pallas_call (grid axis)
N_NODES = 16        # nodes per instance
N_EDGES = 32        # edges per instance
N_GRAPHS = 4        # graphs per instance (range of the batch vector)
F_IN = 16           # data.num_features
DIM = 64            # dim1 == dim2
GC_COUNT = 3
BN_EPS = 1e-5


def gcn_kernel(x_ref, src_ref, meta_ref, ew_ref, w_ref, b_ref, out_ref):
    """One grid step = full GCN forward for one graph-batch instance."""
    x = x_ref[...]                                   # [N, F]
    src = src_ref[...]                               # [E, 1] int32 (edge_index[0])
    dst = meta_ref[:, 0:N_EDGES]                     # [1, E] int32 (edge_index[1])
    bvec = meta_ref[:, N_EDGES:N_EDGES + N_NODES]    # [1, N] int32 (graph id/node)
    ew = ew_ref[...]                                 # [1, E] f32   (edge weights)

    # ---- weighted adjacency  M[i, j] = sum_e w[e]*(dst[e]==i)*(src[e]==j) ----
    # One-hots built directly in MXU-friendly orientation (contract over the
    # trailing axis of the LHS); no cross-lane transposes.
    oh_dst = (lax.broadcasted_iota(jnp.int32, (N_NODES, N_EDGES), 0) == dst
              ).astype(jnp.float32)                                   # [N, E]
    oh_src = (lax.broadcasted_iota(jnp.int32, (N_EDGES, N_NODES), 1) == src
              ).astype(jnp.float32)                                   # [E, N]
    adj = jnp.dot(oh_dst * ew, oh_src,
                  preferred_element_type=jnp.float32)                 # [N, N]

    # GCN norm (improved=True, add_self_loops=False): deg over dst, D^-1/2 A D^-1/2
    deg = jnp.sum(adj, axis=1, keepdims=True)                         # [N, 1]
    dinv = jnp.where(deg > 0.0, lax.rsqrt(deg), 0.0)                  # [N, 1]

    # ---- global_mean_pool matrix with 1/count folded into the one-hot ----
    oh_b = (lax.broadcasted_iota(jnp.int32, (N_GRAPHS, N_NODES), 0) == bvec
            ).astype(jnp.float32)                                     # [B, N]
    cnt = jnp.sum(oh_b, axis=1, keepdims=True)                        # [B, 1]
    pool = oh_b * (1.0 / jnp.maximum(cnt, 1.0))                       # [B, N]

    # ---- pre FC: Linear(F, D) + relu ----
    h = jnp.dot(x, w_ref[0:F_IN, :], preferred_element_type=jnp.float32)
    h = jnp.maximum(h + b_ref[0:1, :], 0.0)

    # ---- GC layers: GCNConv + folded BN(eval) + relu ----
    # TODO(synk): F.dropout with training=False (eval mode) is the identity; no op emitted.
    for l in range(GC_COUNT):
        w_l = w_ref[F_IN + l * DIM:F_IN + (l + 1) * DIM, :]
        hw = jnp.dot(h, w_l, preferred_element_type=jnp.float32)
        agg = dinv * jnp.dot(adj, dinv * hw,
                             preferred_element_type=jnp.float32)
        h = jnp.maximum(agg + b_ref[1 + l:2 + l, :], 0.0)

    # ---- early pool + post FC + lin_out ----
    hg = jnp.dot(pool, h, preferred_element_type=jnp.float32)         # [B, D]
    hg = jnp.dot(hg, w_ref[F_IN + 3 * DIM:F_IN + 4 * DIM, :],
                 preferred_element_type=jnp.float32)
    hg = jnp.maximum(hg + b_ref[4:5, :], 0.0)
    # lin_out (D -> 1): weight stored transposed as a bias-slab row -> lane reduce.
    y = jnp.sum(hg * b_ref[5:6, :], axis=1, keepdims=True) + b_ref[6:7, 0:1]
    out_ref[...] = y                                                   # [B, 1]


def gcn_forward(x, edge_src, edge_dst, edge_w, batch_vec, w_all, b_all):
    """x:[G,N,F], edge_src/dst:[G,E] int, edge_w:[G,E], batch_vec:[N] int."""
    G = x.shape[0]
    src_in = edge_src[:, :, None].astype(jnp.int32)                    # [G, E, 1]
    meta = jnp.concatenate(
        [edge_dst[:, None, :].astype(jnp.int32),
         jnp.broadcast_to(batch_vec[None, None, :].astype(jnp.int32),
                          (G, 1, N_NODES))], axis=2)                   # [G, 1, E+N]
    ew_in = edge_w[:, None, :].astype(jnp.float32)                     # [G, 1, E]

    out = pl.pallas_call(
        gcn_kernel,
        out_shape=jax.ShapeDtypeStruct((G, N_GRAPHS, 1), jnp.float32),
        grid=(G,),
        in_specs=[
            pl.BlockSpec((None, N_NODES, F_IN), lambda g: (g, 0, 0)),          # x
            pl.BlockSpec((None, N_EDGES, 1), lambda g: (g, 0, 0)),             # src
            pl.BlockSpec((None, 1, N_EDGES + N_NODES), lambda g: (g, 0, 0)),   # dst+batch
            pl.BlockSpec((None, 1, N_EDGES), lambda g: (g, 0, 0)),             # edge w
            pl.BlockSpec((F_IN + 4 * DIM, DIM), lambda g: (0, 0)),             # packed W
            pl.BlockSpec((7, DIM), lambda g: (0, 0)),                          # packed b
        ],
        out_specs=pl.BlockSpec((None, N_GRAPHS, 1), lambda g: (g, 0, 0)),
        compiler_params=pltpu.CompilerParams(dimension_semantics=("parallel",)),
    )(x, src_in, meta, ew_in, w_all, b_all)
    return out[:, :, 0]        # output_dim == 1  ->  per-instance out.view(-1)


# ------------------------- parameters & reference -------------------------

def init_raw_params(key):
    ks = jax.random.split(key, 16)

    def unif(k, shape, fan_in):
        b = 1.0 / jnp.sqrt(fan_in)
        return jax.random.uniform(k, shape, jnp.float32, -b, b)

    return {
        "w_pre": unif(ks[0], (F_IN, DIM), F_IN),
        "b_pre": unif(ks[1], (DIM,), F_IN),
        "w_gc": [unif(ks[2 + l], (DIM, DIM), DIM) for l in range(GC_COUNT)],
        "b_gc": [unif(ks[5 + l], (DIM,), DIM) for l in range(GC_COUNT)],
        "gamma": jax.random.uniform(ks[8], (GC_COUNT, DIM), jnp.float32, 0.5, 1.5),
        "beta": jax.random.uniform(ks[9], (GC_COUNT, DIM), jnp.float32, -0.2, 0.2),
        "rmean": jax.random.uniform(ks[10], (GC_COUNT, DIM), jnp.float32, -0.2, 0.2),
        "rvar": jax.random.uniform(ks[11], (GC_COUNT, DIM), jnp.float32, 0.5, 1.5),
        "w_post": unif(ks[12], (DIM, DIM), DIM),
        "b_post": unif(ks[13], (DIM,), DIM),
        "w_out": unif(ks[14], (DIM, 1), DIM),
        "b_out": unif(ks[15], (1,), DIM),
    }


def pack_params(raw):
    """Fold BatchNorm (eval) into GC weights/biases and pack into 2 slabs."""
    scale = raw["gamma"] / jnp.sqrt(raw["rvar"] + BN_EPS)              # [L, D]
    w_gc_f = [raw["w_gc"][l] * scale[l][None, :] for l in range(GC_COUNT)]
    b_gc_f = [(raw["b_gc"][l] - raw["rmean"][l]) * scale[l] + raw["beta"][l]
              for l in range(GC_COUNT)]
    w_all = jnp.concatenate([raw["w_pre"]] + w_gc_f + [raw["w_post"]], axis=0)
    b_all = jnp.zeros((7, DIM), jnp.float32)
    b_all = b_all.at[0].set(raw["b_pre"])
    for l in range(GC_COUNT):
        b_all = b_all.at[1 + l].set(b_gc_f[l])
    b_all = b_all.at[4].set(raw["b_post"])
    b_all = b_all.at[5].set(raw["w_out"][:, 0])     # lin_out weight (as a row)
    b_all = b_all.at[6, 0].set(raw["b_out"][0])     # lin_out bias
    return w_all, b_all


def ref_forward(x_all, src_all, dst_all, ew_all, batch_vec, raw):
    """Pure-JAX reference with unfolded BN params (eval mode)."""
    def single(x, src, dst, ew):
        h = jax.nn.relu(x @ raw["w_pre"] + raw["b_pre"])
        deg = jax.ops.segment_sum(ew, dst, num_segments=N_NODES)
        dinv = jnp.where(deg > 0, 1.0 / jnp.sqrt(deg), 0.0)
        norm = dinv[src] * ew * dinv[dst]
        for l in range(GC_COUNT):
            hw = h @ raw["w_gc"][l]
            agg = jax.ops.segment_sum(norm[:, None] * hw[src], dst,
                                      num_segments=N_NODES) + raw["b_gc"][l]
            s = raw["gamma"][l] / jnp.sqrt(raw["rvar"][l] + BN_EPS)
            agg = (agg - raw["rmean"][l]) * s + raw["beta"][l]
            h = jax.nn.relu(agg)
        cnt = jax.ops.segment_sum(jnp.ones((N_NODES,), jnp.float32), batch_vec,
                                  num_segments=N_GRAPHS)
        pooled = (jax.ops.segment_sum(h, batch_vec, num_segments=N_GRAPHS)
                  / jnp.maximum(cnt, 1.0)[:, None])
        hg = jax.nn.relu(pooled @ raw["w_post"] + raw["b_post"])
        y = hg @ raw["w_out"] + raw["b_out"]
        return y[:, 0]
    return jax.vmap(single)(x_all, src_all, dst_all, ew_all)


if __name__ == "__main__":
    key = jax.random.PRNGKey(0)
    kx, ksrc, kdst, kw, kp = jax.random.split(key, 5)

    x = jax.random.normal(kx, (G_INSTANCES, N_NODES, F_IN), jnp.float32)
    edge_src = jax.random.randint(ksrc, (G_INSTANCES, N_EDGES), 0, N_NODES,
                                  dtype=jnp.int32)
    edge_dst = jax.random.randint(kdst, (G_INSTANCES, N_EDGES), 0, N_NODES,
                                  dtype=jnp.int32)
    edge_w = jax.random.uniform(kw, (G_INSTANCES, N_EDGES), jnp.float32, 0.5, 1.5)
    batch_vec = jnp.arange(N_NODES, dtype=jnp.int32) // (N_NODES // N_GRAPHS)

    raw = init_raw_params(kp)
    w_all, b_all = pack_params(raw)

    out = gcn_forward(x, edge_src, edge_dst, edge_w, batch_vec, w_all, b_all)
    out = jax.block_until_ready(out)

    ref = ref_forward(x, edge_src, edge_dst, edge_w, batch_vec, raw)
    assert out.shape == (G_INSTANCES, N_GRAPHS)
    assert jnp.allclose(out, ref, rtol=1e-3, atol=1e-3), "mismatch vs pure-JAX reference"

    print("KERNEL_OK")
</pallas_src>

<mosaic_0001>
module attributes {stable_mosaic.version = 11 : i64} {
  func.func @gcn_kernel(%arg0: i32, %arg1: memref<1x16x16xf32, #tpu.memory_space<vmem>>, %arg2: memref<1x32x1xi32, #tpu.memory_space<vmem>>, %arg3: memref<1x1x48xi32, #tpu.memory_space<vmem>>, %arg4: memref<1x1x32xf32, #tpu.memory_space<vmem>>, %arg5: memref<272x64xf32, #tpu.memory_space<vmem>>, %arg6: memref<7x64xf32, #tpu.memory_space<vmem>>, %arg7: memref<1x4x1xf32, #tpu.memory_space<vmem>>) attributes {dimension_semantics = [#tpu.dimension_semantics<parallel>], iteration_bounds = array<i64: 8>, scalar_prefetch = 0 : i64, scratch_operands = 0 : i64, tpu.core_type = #tpu.core_type<tc>, window_params = [{transform_indices = @transform_0, window_bounds = array<i64: 1, 16, 16>}, {transform_indices = @transform_1, window_bounds = array<i64: 1, 32, 1>}, {transform_indices = @transform_2, window_bounds = array<i64: 1, 1, 48>}, {transform_indices = @transform_3, window_bounds = array<i64: 1, 1, 32>}, {pipeline_mode = #tpu.pipeline_mode<synchronous>, transform_indices = @transform_4, window_bounds = array<i64: 272, 64>}, {pipeline_mode = #tpu.pipeline_mode<synchronous>, transform_indices = @transform_5, window_bounds = array<i64: 7, 64>}, {transform_indices = @transform_6, window_bounds = array<i64: 1, 4, 1>}]} {
    %c0 = arith.constant 0 : index
    %c0_0 = arith.constant 0 : index
    %c0_1 = arith.constant 0 : index
    %0 = vector.load %arg1[%c0, %c0_0, %c0_1] : memref<1x16x16xf32, #tpu.memory_space<vmem>>, vector<1x16x16xf32>
    %1 = vector.shape_cast %0 : vector<1x16x16xf32> to vector<16x16xf32>
    %c0_2 = arith.constant 0 : index
    %c0_3 = arith.constant 0 : index
    %c0_4 = arith.constant 0 : index
    %2 = vector.load %arg2[%c0_2, %c0_3, %c0_4] : memref<1x32x1xi32, #tpu.memory_space<vmem>>, vector<1x32x1xi32>
    %3 = vector.shape_cast %2 : vector<1x32x1xi32> to vector<32x1xi32>
    %c0_5 = arith.constant 0 : index
    %c0_6 = arith.constant 0 : index
    %c0_7 = arith.constant 0 : index
    %4 = vector.load %arg3[%c0_5, %c0_6, %c0_7] : memref<1x1x48xi32, #tpu.memory_space<vmem>>, vector<1x1x32xi32>
    %5 = vector.shape_cast %4 : vector<1x1x32xi32> to vector<1x32xi32>
    %c0_8 = arith.constant 0 : index
    %c0_9 = arith.constant 0 : index
    %c32 = arith.constant 32 : index
    %6 = vector.load %arg3[%c0_8, %c0_9, %c32] : memref<1x1x48xi32, #tpu.memory_space<vmem>>, vector<1x1x16xi32>
    %7 = vector.shape_cast %6 : vector<1x1x16xi32> to vector<1x16xi32>
    %c0_10 = arith.constant 0 : index
    %c0_11 = arith.constant 0 : index
    %c0_12 = arith.constant 0 : index
    %8 = vector.load %arg4[%c0_10, %c0_11, %c0_12] : memref<1x1x32xf32, #tpu.memory_space<vmem>>, vector<1x1x32xf32>
    %9 = vector.shape_cast %8 : vector<1x1x32xf32> to vector<1x32xf32>
    %10 = tpu.iota {dimensions = array<i32: 0>} : vector<16x32xi32>
    %11 = vector.broadcast %5 : vector<1x32xi32> to vector<16x32xi32>
    %12 = arith.cmpi eq, %10, %11 : vector<16x32xi32>
    %13 = arith.extui %12 : vector<16x32xi1> to vector<16x32xi32>
    %14 = arith.sitofp %13 : vector<16x32xi32> to vector<16x32xf32>
    %15 = tpu.iota {dimensions = array<i32: 1>} : vector<32x16xi32>
    %16 = vector.broadcast %3 : vector<32x1xi32> to vector<32x16xi32>
    %17 = arith.cmpi eq, %15, %16 : vector<32x16xi32>
    %18 = arith.extui %17 : vector<32x16xi1> to vector<32x16xi32>
    %19 = arith.sitofp %18 : vector<32x16xi32> to vector<32x16xf32>
    %20 = vector.broadcast %9 : vector<1x32xf32> to vector<16x32xf32>
    %21 = arith.mulf %14, %20 : vector<16x32xf32>
    %cst = arith.constant dense<0.000000e+00> : vector<16x16xf32>
    %22 = tpu.matmul %21, %19, %cst {dimension_numbers = #tpu.dot_dimension_numbers<[1], [0], [0], [1], [0, 0, 1, 1], [], []>} : vector<16x32xf32>, vector<32x16xf32>, vector<16x16xf32> -> vector<16x16xf32>
    %cst_13 = arith.constant dense<0.000000e+00> : vector<16xf32>
    %23 = vector.multi_reduction <add>, %22, %cst_13 [1] : vector<16x16xf32> to vector<16xf32>
    %24 = vector.shape_cast %23 : vector<16xf32> to vector<16x1xf32>
    %cst_14 = arith.constant 0.000000e+00 : f32
    %25 = vector.broadcast %cst_14 : f32 to vector<16x1xf32>
    %26 = arith.cmpf ogt, %24, %25 : vector<16x1xf32>
    %27 = math.rsqrt %24 : vector<16x1xf32>
    %cst_15 = arith.constant 0.000000e+00 : f32
    %28 = vector.broadcast %cst_15 : f32 to vector<16x1xf32>
    %29 = arith.select %26, %27, %28 : vector<16x1xi1>, vector<16x1xf32>
    %30 = tpu.iota {dimensions = array<i32: 0>} : vector<4x16xi32>
    %31 = vector.broadcast %7 : vector<1x16xi32> to vector<4x16xi32>
    %32 = arith.cmpi eq, %30, %31 : vector<4x16xi32>
    %33 = arith.extui %32 : vector<4x16xi1> to vector<4x16xi32>
    %34 = arith.sitofp %33 : vector<4x16xi32> to vector<4x16xf32>
    %cst_16 = arith.constant dense<0.000000e+00> : vector<4xf32>
    %35 = vector.multi_reduction <add>, %34, %cst_16 [1] : vector<4x16xf32> to vector<4xf32>
    %36 = vector.shape_cast %35 : vector<4xf32> to vector<4x1xf32>
    %cst_17 = arith.constant 1.000000e+00 : f32
    %37 = vector.broadcast %cst_17 : f32 to vector<4x1xf32>
    %38 = arith.maximumf %36, %37 : vector<4x1xf32>
    %cst_18 = arith.constant 1.000000e+00 : f32
    %39 = vector.broadcast %cst_18 : f32 to vector<4x1xf32>
    %40 = arith.divf %39, %38 : vector<4x1xf32>
    %41 = vector.broadcast %40 : vector<4x1xf32> to vector<4x16xf32>
    %42 = arith.mulf %34, %41 : vector<4x16xf32>
    %c0_19 = arith.constant 0 : index
    %c0_20 = arith.constant 0 : index
    %43 = vector.load %arg5[%c0_19, %c0_20] : memref<272x64xf32, #tpu.memory_space<vmem>>, vector<16x64xf32>
    %cst_21 = arith.constant dense<0.000000e+00> : vector<16x64xf32>
    %44 = tpu.matmul %1, %43, %cst_21 {dimension_numbers = #tpu.dot_dimension_numbers<[1], [0], [0], [1], [0, 0, 1, 1], [], []>} : vector<16x16xf32>, vector<16x64xf32>, vector<16x64xf32> -> vector<16x64xf32>
    %c0_22 = arith.constant 0 : index
    %c0_23 = arith.constant 0 : index
    %45 = vector.load %arg6[%c0_22, %c0_23] : memref<7x64xf32, #tpu.memory_space<vmem>>, vector<1x64xf32>
    %46 = vector.broadcast %45 : vector<1x64xf32> to vector<16x64xf32>
    %47 = arith.addf %44, %46 : vector<16x64xf32>
    %cst_24 = arith.constant 0.000000e+00 : f32
    %48 = vector.broadcast %cst_24 : f32 to vector<16x64xf32>
    %49 = arith.maximumf %47, %48 : vector<16x64xf32>
    %c16 = arith.constant 16 : index
    %c0_25 = arith.constant 0 : index
    %50 = vector.load %arg5[%c16, %c0_25] : memref<272x64xf32, #tpu.memory_space<vmem>>, vector<64x64xf32>
    %cst_26 = arith.constant dense<0.000000e+00> : vector<16x64xf32>
    %51 = tpu.matmul %49, %50, %cst_26 {dimension_numbers = #tpu.dot_dimension_numbers<[1], [0], [0], [1], [0, 0, 1, 1], [], []>} : vector<16x64xf32>, vector<64x64xf32>, vector<16x64xf32> -> vector<16x64xf32>
    %52 = vector.broadcast %29 : vector<16x1xf32> to vector<16x64xf32>
    %53 = arith.mulf %52, %51 : vector<16x64xf32>
    %cst_27 = arith.constant dense<0.000000e+00> : vector<16x64xf32>
    %54 = tpu.matmul %22, %53, %cst_27 {dimension_numbers = #tpu.dot_dimension_numbers<[1], [0], [0], [1], [0, 0, 1, 1], [], []>} : vector<16x16xf32>, vector<16x64xf32>, vector<16x64xf32> -> vector<16x64xf32>
    %55 = vector.broadcast %29 : vector<16x1xf32> to vector<16x64xf32>
    %56 = arith.mulf %55, %54 : vector<16x64xf32>
    %c1 = arith.constant 1 : index
    %c0_28 = arith.constant 0 : index
    %57 = vector.load %arg6[%c1, %c0_28] : memref<7x64xf32, #tpu.memory_space<vmem>>, vector<1x64xf32>
    %58 = vector.broadcast %57 : vector<1x64xf32> to vector<16x64xf32>
    %59 = arith.addf %56, %58 : vector<16x64xf32>
    %cst_29 = arith.constant 0.000000e+00 : f32
    %60 = vector.broadcast %cst_29 : f32 to vector<16x64xf32>
    %61 = arith.maximumf %59, %60 : vector<16x64xf32>
    %c80 = arith.constant 80 : index
    %c0_30 = arith.constant 0 : index
    %62 = vector.load %arg5[%c80, %c0_30] : memref<272x64xf32, #tpu.memory_space<vmem>>, vector<64x64xf32>
    %cst_31 = arith.constant dense<0.000000e+00> : vector<16x64xf32>
    %63 = tpu.matmul %61, %62, %cst_31 {dimension_numbers = #tpu.dot_dimension_numbers<[1], [0], [0], [1], [0, 0, 1, 1], [], []>} : vector<16x64xf32>, vector<64x64xf32>, vector<16x64xf32> -> vector<16x64xf32>
    %64 = vector.broadcast %29 : vector<16x1xf32> to vector<16x64xf32>
    %65 = arith.mulf %64, %63 : vector<16x64xf32>
    %cst_32 = arith.constant dense<0.000000e+00> : vector<16x64xf32>
    %66 = tpu.matmul %22, %65, %cst_32 {dimension_numbers = #tpu.dot_dimension_numbers<[1], [0], [0], [1], [0, 0, 1, 1], [], []>} : vector<16x16xf32>, vector<16x64xf32>, vector<16x64xf32> -> vector<16x64xf32>
    %67 = vector.broadcast %29 : vector<16x1xf32> to vector<16x64xf32>
    %68 = arith.mulf %67, %66 : vector<16x64xf32>
    %c2 = arith.constant 2 : index
    %c0_33 = arith.constant 0 : index
    %69 = vector.load %arg6[%c2, %c0_33] : memref<7x64xf32, #tpu.memory_space<vmem>>, vector<1x64xf32>
    %70 = vector.broadcast %69 : vector<1x64xf32> to vector<16x64xf32>
    %71 = arith.addf %68, %70 : vector<16x64xf32>
    %cst_34 = arith.constant 0.000000e+00 : f32
    %72 = vector.broadcast %cst_34 : f32 to vector<16x64xf32>
    %73 = arith.maximumf %71, %72 : vector<16x64xf32>
    %c144 = arith.constant 144 : index
    %c0_35 = arith.constant 0 : index
    %74 = vector.load %arg5[%c144, %c0_35] : memref<272x64xf32, #tpu.memory_space<vmem>>, vector<64x64xf32>
    %cst_36 = arith.constant dense<0.000000e+00> : vector<16x64xf32>
    %75 = tpu.matmul %73, %74, %cst_36 {dimension_numbers = #tpu.dot_dimension_numbers<[1], [0], [0], [1], [0, 0, 1, 1], [], []>} : vector<16x64xf32>, vector<64x64xf32>, vector<16x64xf32> -> vector<16x64xf32>
    %76 = vector.broadcast %29 : vector<16x1xf32> to vector<16x64xf32>
    %77 = arith.mulf %76, %75 : vector<16x64xf32>
    %cst_37 = arith.constant dense<0.000000e+00> : vector<16x64xf32>
    %78 = tpu.matmul %22, %77, %cst_37 {dimension_numbers = #tpu.dot_dimension_numbers<[1], [0], [0], [1], [0, 0, 1, 1], [], []>} : vector<16x16xf32>, vector<16x64xf32>, vector<16x64xf32> -> vector<16x64xf32>
    %79 = vector.broadcast %29 : vector<16x1xf32> to vector<16x64xf32>
    %80 = arith.mulf %79, %78 : vector<16x64xf32>
    %c3 = arith.constant 3 : index
    %c0_38 = arith.constant 0 : index
    %81 = vector.load %arg6[%c3, %c0_38] : memref<7x64xf32, #tpu.memory_space<vmem>>, vector<1x64xf32>
    %82 = vector.broadcast %81 : vector<1x64xf32> to vector<16x64xf32>
    %83 = arith.addf %80, %82 : vector<16x64xf32>
    %cst_39 = arith.constant 0.000000e+00 : f32
    %84 = vector.broadcast %cst_39 : f32 to vector<16x64xf32>
    %85 = arith.maximumf %83, %84 : vector<16x64xf32>
    %cst_40 = arith.constant dense<0.000000e+00> : vector<4x64xf32>
    %86 = tpu.matmul %42, %85, %cst_40 {dimension_numbers = #tpu.dot_dimension_numbers<[1], [0], [0], [1], [0, 0, 1, 1], [], []>} : vector<4x16xf32>, vector<16x64xf32>, vector<4x64xf32> -> vector<4x64xf32>
    %c208 = arith.constant 208 : index
    %c0_41 = arith.constant 0 : index
    %87 = vector.load %arg5[%c208, %c0_41] : memref<272x64xf32, #tpu.memory_space<vmem>>, vector<64x64xf32>
    %cst_42 = arith.constant dense<0.000000e+00> : vector<4x64xf32>
    %88 = tpu.matmul %86, %87, %cst_42 {dimension_numbers = #tpu.dot_dimension_numbers<[1], [0], [0], [1], [0, 0, 1, 1], [], []>} : vector<4x64xf32>, vector<64x64xf32>, vector<4x64xf32> -> vector<4x64xf32>
    %c4 = arith.constant 4 : index
    %c0_43 = arith.constant 0 : index
    %89 = vector.load %arg6[%c4, %c0_43] : memref<7x64xf32, #tpu.memory_space<vmem>>, vector<1x64xf32>
    %90 = vector.broadcast %89 : vector<1x64xf32> to vector<4x64xf32>
    %91 = arith.addf %88, %90 : vector<4x64xf32>
    %cst_44 = arith.constant 0.000000e+00 : f32
    %92 = vector.broadcast %cst_44 : f32 to vector<4x64xf32>
    %93 = arith.maximumf %91, %92 : vector<4x64xf32>
    %c5 = arith.constant 5 : index
    %c0_45 = arith.constant 0 : index
    %94 = vector.load %arg6[%c5, %c0_45] : memref<7x64xf32, #tpu.memory_space<vmem>>, vector<1x64xf32>
    %95 = vector.broadcast %94 : vector<1x64xf32> to vector<4x64xf32>
    %96 = arith.mulf %93, %95 : vector<4x64xf32>
    %cst_46 = arith.constant dense<0.000000e+00> : vector<4xf32>
    %97 = vector.multi_reduction <add>, %96, %cst_46 [1] : vector<4x64xf32> to vector<4xf32>
    %98 = vector.shape_cast %97 : vector<4xf32> to vector<4x1xf32>
    %c6 = arith.constant 6 : index
    %c0_47 = arith.constant 0 : index
    %99 = vector.load %arg6[%c6, %c0_47] : memref<7x64xf32, #tpu.memory_space<vmem>>, vector<1x1xf32>
    %100 = vector.broadcast %99 : vector<1x1xf32> to vector<4x1xf32>
    %101 = arith.addf %98, %100 : vector<4x1xf32>
    %c0_48 = arith.constant 0 : index
    %c0_49 = arith.constant 0 : index
    %c0_50 = arith.constant 0 : index
    %102 = vector.load %arg7[%c0_48, %c0_49, %c0_50] : memref<1x4x1xf32, #tpu.memory_space<vmem>>, vector<1x4x1xf32>
    %103 = vector.shape_cast %102 : vector<1x4x1xf32> to vector<4x1xf32>
    %104 = vector.shape_cast %101 : vector<4x1xf32> to vector<1x4x1xf32>
    tpu.vector_store %arg7[%c0_48, %c0_49, %c0_50], %104 {strides = array<i32>} : memref<1x4x1xf32, #tpu.memory_space<vmem>>, vector<1x4x1xf32>,
    return
  }
  func.func @transform_0(%arg0: i32) -> (i32, i32, i32) {
    %c0_i32 = arith.constant 0 : i32
    %c0_i32_0 = arith.constant 0 : i32
    %c0_i32_1 = arith.constant 0 : i32
    return %arg0, %c0_i32, %c0_i32_0 : i32, i32, i32
  }
  func.func @transform_1(%arg0: i32) -> (i32, i32, i32) {
    %c0_i32 = arith.constant 0 : i32
    %c0_i32_0 = arith.constant 0 : i32
    %c0_i32_1 = arith.constant 0 : i32
    return %arg0, %c0_i32, %c0_i32_0 : i32, i32, i32
  }
  func.func @transform_2(%arg0: i32) -> (i32, i32, i32) {
    %c0_i32 = arith.constant 0 : i32
    %c0_i32_0 = arith.constant 0 : i32
    %c0_i32_1 = arith.constant 0 : i32
    return %arg0, %c0_i32, %c0_i32_0 : i32, i32, i32
  }
  func.func @transform_3(%arg0: i32) -> (i32, i32, i32) {
    %c0_i32 = arith.constant 0 : i32
    %c0_i32_0 = arith.constant 0 : i32
    %c0_i32_1 = arith.constant 0 : i32
    return %arg0, %c0_i32, %c0_i32_0 : i32, i32, i32
  }
  func.func @transform_4(%arg0: i32) -> (i32, i32) {
    %c0_i32 = arith.constant 0 : i32
    %c0_i32_0 = arith.constant 0 : i32
    %c0_i32_1 = arith.constant 0 : i32
    return %c0_i32, %c0_i32_0 : i32, i32
  }
  func.func @transform_5(%arg0: i32) -> (i32, i32) {
    %c0_i32 = arith.constant 0 : i32
    %c0_i32_0 = arith.constant 0 : i32
    %c0_i32_1 = arith.constant 0 : i32
    return %c0_i32, %c0_i32_0 : i32, i32
  }
  func.func @transform_6(%arg0: i32) -> (i32, i32, i32) {
    %c0_i32 = arith.constant 0 : i32
    %c0_i32_0 = arith.constant 0 : i32
    %c0_i32_1 = arith.constant 0 : i32
    return %arg0, %c0_i32, %c0_i32_0 : i32, i32, i32
  }
}

</mosaic_0001>

<bundles_post_ra>
// kernel: tpu_custom_call.1
= control target key start
LH: loop header
LB: loop body
LE: loop exit
PB: predicated region body
PF: predicated region fallthrough
CT: control target
= control target key end

     0   :  { %s1746_s21 = smov 0   ;;  %s1961_s0 = inlined_call_operand.vmem [shape: f32[8,16,16], index: 0, kind: input, shape index: {}]   ;;  %s1962_s1 = inlined_call_operand.vmem [shape: s32[8,32,1], index: 1, kind: input, shape index: {}]   ;;  %s1963_s2 = inlined_call_operand.vmem [shape: s32[8,1,48], index: 2, kind: input, shape index: {}]   ;;  %s1964_s3 = inlined_call_operand.vmem [shape: f32[8,1,32], index: 3, kind: input, shape index: {}]   ;;  %s1965_s4 = inlined_call_operand.vmem [shape: f32[272,64], index: 4, kind: input, shape index: {}]   ;;  %s1966_s5 = inlined_call_operand.vmem [shape: f32[7,64], index: 5, kind: input, shape index: {}]   ;;  %s1967_s6 = inlined_call_operand.vmem [shape: f32[8,4,1], index: 6, kind: output, shape index: {}]  }
   0x1 LB: > { %s1351_s22 = sadd.s32 4294967295, %s1703_s21   ;;  %p1355_p0 = scmp.ge.s32.totalorder %s1703_s21, 1  ;;  %s1703_s21 = sphi %s1746_s21, %s16_s21  }
   0x2   : > { %p238_p1 = scmp.lt.s32.totalorder %s1703_s21, 9 }
   0x4   : > { %p239_p2 = pnand %p1355_p0, %p238_p1 }
   0x5   : > { %p278_p3 = scmp.lt.s32.totalorder (!%p239_p2), %s1351_s22, 7  ;;  %v1705_v0 = vmov (!%p239_p2), 0   ;;  %v306_v5 = vlaneseq (!%p239_p2)  ;;  %v1706_v10 = vmov (!%p239_p2), 0.0   ;;  %vm353_vm2 = vcmask (!%p239_p2), 261120   ;;  %v460_v20 = vld [vmem:[%s1965_s4] sm:$0xff] (!%p239_p2)  ;;  %v461_v21 = vld [vmem:[%s1965_s4 + $0x8] sm:$0xff] (!%p239_p2) }
   0x6   : > { %242 = sbr.rel (%p239_p2) target bundleno = 2284 (0x8ec), region = 44  ;;  %1690 = vset.pattern.permute.xlu1 (!%p239_p2), %v1705_v0  ;;  %1689 = vset.pattern.permute.xlu0 (!%p239_p2), %v1705_v0  ;;  %v1707_v22 = vmov (!%p239_p2), 1.0|1.0   ;;  %v1596_v23 = vpack.c.bf16 (!%p239_p2), %v461_v21, %v460_v20  ;;  %v550_v24 = vld [vmem:[%s1965_s4 + $0x10] sm:$0xff] (!%p239_p2)  ;;  %v551_v25 = vld [vmem:[%s1965_s4 + $0x18] sm:$0xff] (!%p239_p2)  ;;  %vm435_vm9 = vcmask (!%p239_p2), 130048  }
   0x7   : > { %v307_v6 = vshrl.u32 (!%p239_p2), %v306_v5, 7  ;;  %v320_v17 = vand.u32 (!%p239_p2), 127, %v306_v5  ;;  %v1600_v27 = vpack.c.bf16 (!%p239_p2), %v551_v25, %v550_v24  ;;  %v552_v28 = vld [vmem:[%s1965_s4 + $0x20] sm:$0xff] (!%p239_p2)  ;;  %v553_v29 = vld [vmem:[%s1965_s4 + $0x28] sm:$0xff] (!%p239_p2)  ;;  %v554_v32 = vld [vmem:[%s1965_s4 + $0x30] sm:$0xff] (!%p239_p2)  ;;  %vm558_vm10 = vcmask (!%p239_p2), 523264  }
   0x8   : > { %v1604_v31 = vpack.c.bf16 (!%p239_p2), %v553_v29, %v552_v28  ;;  %v555_v33 = vld [vmem:[%s1965_s4 + $0x38] sm:$0xff] (!%p239_p2)  ;;  %v556_v35 = vld [vmem:[%s1965_s4 + $0x40] sm:$0xff] (!%p239_p2)  ;;  %v557_v36 = vld [vmem:[%s1965_s4 + $0x48] sm:$0xff] (!%p239_p2)  ;;  %s1708_s27 = smov (!%p239_p2), 96   ;;  %vm452_vm13 = vcmask (!%p239_p2), 125952   ;;  %vm1710_vm14 = vmmov (!%p239_p2), 0  }
   0x9   : > { %v308_v8 = vadd.s32 (!%p239_p2), 8, %v307_v6  ;;  %v1608_v34 = vpack.c.bf16 (!%p239_p2), %v555_v33, %v554_v32  ;;  %v1612_v37 = vpack.c.bf16 (!%p239_p2), %v557_v36, %v556_v35  ;;  %v1375_v42 = vld [vmem:[%s1966_s5] ss:$0 sm:$0xff] (!%p239_p2)  ;;  %v734_v58 = vld [vmem:[%s1965_s4 + $0x50] sm:$0xff] (!%p239_p2)  ;;  %v735_v59 = vld [vmem:[%s1965_s4 + $0x58] sm:$0xff] (!%p239_p2)  ;;  %vm1256_vm15 = vcmask (!%p239_p2), 519168  }
   0xa   : > { %v1620_v62 = vpack.c.bf16 (!%p239_p2), %v735_v59, %v734_v58  ;;  %v736_v63 = vld [vmem:[%s1965_s4 + $0x60] sm:$0xff] (!%p239_p2)  ;;  %v737_v0 = vld [vmem:[%s1965_s4 + $0x68] sm:$0xff] (!%p239_p2)  ;;  %v1709_v59 = vmov (!%p239_p2), 0.0|0.0  }
   0xb   : > { %v740_v5 = vld [vmem:[%s1965_s4 + $0x80] sm:$0xff] (!%p239_p2)  ;;  %v914_v28 = vld [vmem:[%s1965_s4 + $0xa8] sm:$0xff] (!%p239_p2) }
   0xc   : > { %v917_v33 = vld [vmem:[%s1965_s4 + $0xc0] sm:$0xff] (!%p239_p2) }
   0xd   : > { %s1969_s22 = smov (!%p278_p3, %s1351_s22), 7 }
   0xe   : > { %s1401_s23 = sshll.u32 %s1969_s22, 5  ;;  %s290_s29 = scalar_lea.vmem %s1963_s2, %s1969_s22 }
   0xf   : > { %s287_s26 = scalar_lea.vmem %s1962_s1, %s1401_s23  ;;  %v1361_v7 = vld [vmem:[%s290_s29] ss:$0 sm:$0xff]  ;;  %s293_s8 = scalar_lea.vmem %s1964_s3, %s1969_s22 }
  0x10   : > { %v302_v1 = vld [vmem:[%s287_s26 + $0x10] sm:$0xff]  ;;  %v300_v2 = vld [vmem:[%s287_s26] sm:$0xff]  ;;  %v303_v3 = vld [vmem:[%s287_s26 + $0x18] sm:$0xff]  ;;  %vm313_vm0 = vcmp.eq.s32.totalorder %v307_v6, %v1361_v7  ;;  %vm314_vm1 = vcmp.eq.s32.totalorder %v308_v8, %v1361_v7  ;;  %s1400_s13 = sshll.u32 %s1969_s22, 4  ;;  %s1360_s30 = sshll.u32 %s1969_s22, 2 }
  0x11   : > { %328 = vperm.xlu1 %1690, %v302_v1   ;;  %322 = vperm.xlu0 %1689, %v300_v2   ;;  %v301_v4 = vld [vmem:[%s287_s26 + $0x8] sm:$0xff]  ;;  %v1368_v9 = vld [vmem:[%s293_s8] ss:$0 sm:$0xff]  ;;  %v1769_v11 = vsel %vm313_vm0, 1.0, %v1706_v10  ;;  %v1363_v12 = vsel %vm314_vm1, 1.0, %v1706_v10  ;;  %s282_s16 = scalar_lea.vmem %s1961_s0, %s1400_s13  ;;  %v1624_v1 = vpack.c.bf16 %v737_v0, %v736_v63  ;;  %v738_v2 = vld [vmem:[%s1965_s4 + $0x70] sm:$0xff]  ;;  %s297_s11 = scalar_lea.vmem %s1967_s6, %s1360_s30 }
  0x12   : > { %v351_v13 = vmul.f32 %v1368_v9, %v1769_v11  ;;  %v352_v14 = vmul.f32 %v1368_v9, %v1363_v12  ;;  %v298_v26 = vld [vmem:[%s282_s16] sm:$0xff]  ;;  %v299_v30 = vld [vmem:[%s282_s16 + $0x8] sm:$0xff]  ;;  %vm1266_vm0 = vcmask 3072  }
  0x13   : > { %v741_v6 = vld [vmem:[%s1965_s4 + $0x88] sm:$0xff]  ;;  %v1382_v9 = vld [vmem:[%s1966_s5 + $0x1] ss:$0 sm:$0xff] }
  0x14   : > { %1474 = vmatprep.mubr.msk.f32.mxu1 %vm353_vm2, %v351_v13  ;;  %v1632_v7 = vpack.c.bf16 %v741_v6, %v740_v5 }
  0x15   : > { %331 = vperm.xlu1 %1690, %v303_v3   ;;  %325 = vperm.xlu0 %1689, %v301_v4   ;;  %v739_v3 = vld [vmem:[%s1965_s4 + $0x78] sm:$0xff] }
  0x16   : > { %v1628_v4 = vpack.c.bf16 %v739_v3, %v738_v2  ;;  %v1163_v3 = vld [vmem:[%s1965_s4 + $0xd0] sm:$0xff] }
  0x90   : > { %v329_v15 = vpop.permute.xlu1 %328  ;;  %v323_v16 = vpop.permute.xlu0 %322 }
  0x91   : > { %vm335_vm4 = vcmp.eq.s32.totalorder %v320_v17, %v329_v15  ;;  %vm333_vm5 = vcmp.eq.s32.totalorder %v320_v17, %v323_v16 }
  0x94   : > { %v332_v18 = vpop.permute.xlu1 %331  ;;  %v326_v19 = vpop.permute.xlu0 %325 }
  0x95   : > { %vm334_vm3 = vcmp.eq.s32.totalorder %v320_v17, %v326_v19  ;;  %vm336_vm6 = vcmp.eq.s32.totalorder %v320_v17, %v332_v18 }
  0x96   : > { %vm1588_vm7 = vmpackc.low %vm334_vm3, %vm333_vm5 }
  0x97   : > { %1589 = vmatprep.subr.msk.bf16.mxu1 %vm1588_vm7, %v1707_v22  ;;  %vm1592_vm8 = vmpackc.low %vm336_vm6, %vm335_vm4 }
  0x98   : > { %1591 = vmatpush3.bf16.msk.msra.mxu1 %vm1588_vm7, %v1707_v22 }
  0x99   : > { %1593 = vmatprep.subr.msk.bf16.mxu1 %vm1592_vm8, %v1707_v22 }
  0x9c   : > { %1595 = vmatpush3.bf16.msk.msra.mxu1 %vm1592_vm8, %v1707_v22  ;;  %v911_v22 = vld [vmem:[%s1965_s4 + $0x90] sm:$0xff] }
  0x9d   : > { %1597 = vmatprep.subr.bf16.mxu1 %v1596_v23 }
  0x9f   : > { %1475 = vmatmul.mubr.msk.f32.vlgmr.msra.gmra.mrb[0].mxu1 %vm353_vm2, %v352_v14 }
  0xa0   : > { %1599 = vmatpush3.bf16.msra.mxu1 %v1596_v23  ;;  %1481 = vmatprep.mubr.msk.f32.mxu1 %vm435_vm9, %v298_v26  ;;  %v912_v23 = vld [vmem:[%s1965_s4 + $0x98] sm:$0xff] }
  0xa1   : > { %1601 = vmatprep.subr.bf16.mxu1 %v1600_v27  ;;  %v1640_v26 = vpack.c.bf16 %v912_v23, %v911_v22  ;;  %v1396_v22 = vld [vmem:[%s1966_s5 + $0x5] ss:$0 sm:$0xff] }
  0xa3   : > { %1482 = vmatmul.mubr.msk.f32.vlgmr.msra.gmra.mrb[2].mxu1 %vm435_vm9, %v299_v30  ;;  %v915_v30 = vld [vmem:[%s1965_s4 + $0xb0] sm:$0xff] }
  0xa4   : > { %1603 = vmatpush3.bf16.msra.mxu1 %v1600_v27  ;;  %v913_v27 = vld [vmem:[%s1965_s4 + $0xa0] sm:$0xff] }
  0xa5   : > { %1605 = vmatprep.subr.bf16.mxu1 %v1604_v31  ;;  %v1644_v29 = vpack.c.bf16 %v914_v28, %v913_v27 }
  0xa8   : > { %1607 = vmatpush3.bf16.msra.mxu1 %v1604_v31  ;;  %v916_v31 = vld [vmem:[%s1965_s4 + $0xb8] sm:$0xff] }
  0xa9   : > { %1609 = vmatprep.subr.bf16.mxu1 %v1608_v34  ;;  %v1648_v32 = vpack.c.bf16 %v916_v31, %v915_v30 }
  0xac   : > { %1611 = vmatpush3.bf16.msra.mxu1 %v1608_v34  ;;  %v918_v34 = vld [vmem:[%s1965_s4 + $0xc8] sm:$0xff] }
  0xad   : > { %1613 = vmatprep.subr.bf16.mxu1 %v1612_v37  ;;  %v1652_v35 = vpack.c.bf16 %v918_v34, %v917_v33 }
  0xb0   : > { %1615 = vmatpush3.bf16.msra.mxu1 %v1612_v37 }
 0x172   : > { %v1811_v38 = vpop.f32.mrb[0].mxu1 }
 0x173   : > { %v1813_v39 = vpop.f32.mrb[1].mxu1  ;;  %v439_v40 = vsel %vm435_vm9, %v1811_v38, 0.0 }
 0x174   : > { %440 = vadd.xlane.f32.xlu1 %v439_v40  ;;  %1507 = vmatprep.mubr.msk.f32.mxu0 %vm435_vm9, %v1813_v39  ;;  %v436_v41 = vsel %vm435_vm9, %v1813_v39, 0.0  ;;  %v1387_v40 = vld [vmem:[%s1966_s5 + $0x2] ss:$0 sm:$0xff] }
 0x175   : > { %437 = vadd.xlane.f32.xlu0 %v436_v41 }
 0x176   : > { %v1483_v43 = vpop.f32.mrb[2].mxu1 }
 0x177   : > { %v545_v44 = vadd.f32 %v1483_v43, %v1375_v42  ;;  %v539_v45 = vpop.f32.mrb[3].mxu1 }
 0x178   : > { %v540_v46 = vadd.f32 %v1375_v42, %v539_v45 }
 0x179   : > { %v549_v48 = vmax.f32 %v545_v44, 0.0 }
 0x17a   : > { %v548_v47 = vmax.f32 %v540_v46, 0.0 }
 0x17c   : > { %1500 = vmatprep.mubr.msk.f32.mxu1 %vm558_vm10, %v548_v47 }
 0x17d   : > { %1501 = vmatmul.mubr.msk.f32.vlgmr.msra.gmra.mrb[4].mxu1 %vm558_vm10, %v549_v48 }
 0x17e   : > { %1533 = vmatprep.mubr.msk.f32.mxu1 %vm435_vm9, %v1813_v39 }
 0x18b   : > { %449 = vrot.lane.b32.xlu0 %v1769_v11, %s1708_s27 }
 0x201   : > { %v441_v49 = vpop.xlane.xlu1 %440 }
 0x202   : > { %v438_v50 = vpop.xlane.xlu0 %437  ;;  %1691 = vrsqrt.f32 %v441_v49  ;;  %vm443_vm11 = vcmp.gt.f32.partialorder %v441_v49, 0.0 }
 0x203   : > { %1693 = vrsqrt.f32 %v438_v50  ;;  %vm442_vm12 = vcmp.gt.f32.partialorder %v438_v50, 0.0 }
 0x206   : > { %v450_v36 = vpop.permute.xlu0 %449 }
 0x207   : > { %v453_v37 = vsel %vm452_vm13, %v450_v36, 0.0 }
 0x208   : > { %454 = vadd.xlane.f32.xlu1 %v453_v37 }
 0x20c   : > { %v1692_v51 = vpop.eup %1691 }
 0x20d   : > { %v1694_v52 = vpop.eup %1693  ;;  %v1828_v53 = vsel %vm443_vm11, %v1692_v51, 0.0 }
 0x20e   : > { %v1830_v55 = vsel %vm442_vm12, %v1694_v52, 0.0 }
 0x250   : > { %v1502_v54 = vpop.f32.mrb[4].mxu1 }
 0x251   : > { %v641_v56 = vmul.f32 %v1502_v54, %v1828_v53  ;;  %v631_v57 = vpop.f32.mrb[5].mxu1 }
 0x252   : > { %v640_v60 = vmul.f32 %v631_v57, %v1830_v55 }
 0x254   : > { %v1616_v61 = vpack.c.bf16 %v641_v56, %v640_v60  ;;  %v1392_v60 = vld [vmem:[%s1966_s5 + $0x3] ss:$0 sm:$0xff] }
 0x256   : > { %1617 = vmatprep.subr.bf16.mxu0 %v1616_v61 }
 0x257   : > { %1619 = vmatpush3.bf16.msra.mxu0 %v1616_v61 }
 0x258   : > { %1621 = vmatprep.subr.bf16.mxu0 %v1620_v62 }
 0x25a   : > { %1508 = vmatmul.mubr.msk.f32.vlgmr.msra.gmra.mrb[0].mxu0 %vm435_vm9, %v1811_v38 }
 0x25b   : > { %1623 = vmatpush3.bf16.msra.mxu0 %v1620_v62 }
 0x25c   : > { %1625 = vmatprep.subr.bf16.mxu0 %v1624_v1 }
 0x25f   : > { %1627 = vmatpush3.bf16.msra.mxu0 %v1624_v1 }
 0x260   : > { %1629 = vmatprep.subr.bf16.mxu0 %v1628_v4 }
 0x263   : > { %1631 = vmatpush3.bf16.msra.mxu0 %v1628_v4  ;;  %v1164_v4 = vld [vmem:[%s1965_s4 + $0xd8] sm:$0xff] }
 0x264   : > { %1633 = vmatprep.subr.bf16.mxu0 %v1632_v7 }
 0x267   : > { %1635 = vmatpush3.bf16.msra.mxu0 %v1632_v7  ;;  %v1664_v7 = vpack.c.bf16 %v1164_v4, %v1163_v3 }
 0x295   : > { %v455_v48 = vpop.xlane.xlu1 %454 }
 0x296   : > { %v456_v49 = vmax.f32 %v455_v48, 1.0 }
 0x298   : > { %1695 = vrcp.f32 %v456_v49 }
 0x2a2   : > { %v1696_v50 = vpop.eup %1695 }
 0x2a3   : > { %v459_v51 = vmul.f32 %v1696_v50, %v1769_v11 }
 0x2a5   : > { %1089 = vrot.lane.b32.xlu1 %v459_v51, %s1708_s27 }
 0x317   : > { %v1090_v6 = vpop.permute.xlu1 %1089 }
 0x32d   : > { %v1509_v8 = vpop.f32.mrb[0].mxu0 }
 0x32e   : > { %v724_v12 = vmul.f32 %v1509_v8, %v1828_v53  ;;  %v714_v13 = vpop.f32.mrb[1].mxu0 }
 0x32f   : > { %v723_v14 = vmul.f32 %v714_v13, %v1830_v55 }
 0x330   : > { %v731_v15 = vadd.f32 %v1382_v9, %v724_v12  ;;  %v1168_v12 = vld [vmem:[%s1965_s4 + $0xf8] sm:$0xff] }
 0x331   : > { %v730_v16 = vadd.f32 %v1382_v9, %v723_v14  ;;  %v1167_v9 = vld [vmem:[%s1965_s4 + $0xf0] sm:$0xff]  ;;  %v1169_v14 = vld [vmem:[%s1965_s4 + $0x100] sm:$0xff] }
 0x332   : > { %v733_v18 = vmax.f32 %v731_v15, 0.0  ;;  %v1670_v13 = vpack.c.bf16 %v1168_v12, %v1167_v9 }
 0x333   : > { %v732_v17 = vmax.f32 %v730_v16, 0.0 }
 0x335   : > { %1526 = vmatprep.mubr.msk.f32.mxu0 %vm558_vm10, %v732_v17 }
 0x336   : > { %1527 = vmatmul.mubr.msk.f32.vlgmr.msra.gmra.mrb[2].mxu0 %vm558_vm10, %v733_v18  ;;  %v1394_v18 = vld [vmem:[%s1966_s5 + $0x4] ss:$0 sm:$0xff] }
 0x337   : > { %1559 = vmatprep.mubr.msk.f32.mxu0 %vm435_vm9, %v1813_v39 }
 0x409   : > { %v1528_v19 = vpop.f32.mrb[2].mxu0 }
 0x40a   : > { %v824_v20 = vmul.f32 %v1528_v19, %v1828_v53  ;;  %v814_v21 = vpop.f32.mrb[3].mxu0 }
 0x40b   : > { %v823_v24 = vmul.f32 %v814_v21, %v1830_v55 }
 0x40d   : > { %v1636_v25 = vpack.c.bf16 %v824_v20, %v823_v24 }
 0x40f   : > { %1637 = vmatprep.subr.bf16.mxu1 %v1636_v25 }
 0x410   : > { %1639 = vmatpush3.bf16.msra.mxu1 %v1636_v25 }
 0x411   : > { %1641 = vmatprep.subr.bf16.mxu1 %v1640_v26 }
 0x413   : > { %1534 = vmatmul.mubr.msk.f32.vlgmr.msra.gmra.mrb[6].mxu1 %vm435_vm9, %v1811_v38 }
 0x414   : > { %1643 = vmatpush3.bf16.msra.mxu1 %v1640_v26  ;;  %v1397_v26 = vld [vmem:[%s1966_s5 + $0x6] ss:$0 sm:$0xff] }
 0x415   : > { %1645 = vmatprep.subr.bf16.mxu1 %v1644_v29 }
 0x418   : > { %1647 = vmatpush3.bf16.msra.mxu1 %v1644_v29 }
 0x419   : > { %1649 = vmatprep.subr.bf16.mxu1 %v1648_v32 }
 0x41c   : > { %1651 = vmatpush3.bf16.msra.mxu1 %v1648_v32 }
 0x41d   : > { %1653 = vmatprep.subr.bf16.mxu1 %v1652_v35 }
 0x420   : > { %1655 = vmatpush3.bf16.msra.mxu1 %v1652_v35 }
 0x4e6   : > { %v1535_v39 = vpop.f32.mrb[6].mxu1 }
 0x4e7   : > { %v901_v41 = vmul.f32 %v1535_v39, %v1828_v53  ;;  %v891_v42 = vpop.f32.mrb[7].mxu1 }
 0x4e8   : > { %v900_v43 = vmul.f32 %v891_v42, %v1830_v55 }
 0x4e9   : > { %v908_v44 = vadd.f32 %v1387_v40, %v901_v41 }
 0x4ea   : > { %v907_v45 = vadd.f32 %v1387_v40, %v900_v43 }
 0x4eb   : > { %v910_v47 = vmax.f32 %v908_v44, 0.0 }
 0x4ec   : > { %v909_v46 = vmax.f32 %v907_v45, 0.0 }
 0x4ee   : > { %1552 = vmatprep.mubr.msk.f32.mxu1 %vm558_vm10, %v909_v46 }
 0x4ef   : > { %1553 = vmatmul.mubr.msk.f32.vlgmr.msra.gmra.mrb[8].mxu1 %vm558_vm10, %v910_v47 }
 0x5c2   : > { %v1554_v52 = vpop.f32.mrb[8].mxu1 }
 0x5c3   : > { %v1001_v54 = vmul.f32 %v1554_v52, %v1828_v53  ;;  %v991_v56 = vpop.f32.mrb[9].mxu1 }
 0x5c4   : > { %v1000_v57 = vmul.f32 %v991_v56, %v1830_v55 }
 0x5c6   : > { %v1656_v58 = vpack.c.bf16 %v1001_v54, %v1000_v57 }
 0x5c8   : > { %1657 = vmatprep.subr.bf16.mxu0 %v1656_v58 }
 0x5c9   : > { %1659 = vmatpush3.bf16.msra.mxu0 %v1656_v58 }
 0x5ca   : > { %1660 = vmatprep.subr.bf16.mxu0 %v1709_v59 }
 0x5cc   : > { %1560 = vmatmul.mubr.msk.f32.vlgmr.msra.gmra.mrb[4].mxu0 %vm435_vm9, %v1811_v38 }
 0x5cd   : > { %1566 = vmatprep.mubr.msk.f32.mxu0 %vm1710_vm14, %v1706_v10 }
 0x69f   : > { %v1561_v11 = vpop.f32.mrb[4].mxu0 }
 0x6a0   : > { %v1078_v61 = vmul.f32 %v1561_v11, %v1828_v53  ;;  %v1068_v62 = vpop.f32.mrb[5].mxu0  ;;  %v1165_v53 = vld [vmem:[%s1965_s4 + $0xe0] sm:$0xff] }
 0x6a1   : > { %v1077_v63 = vmul.f32 %v1068_v62, %v1830_v55  ;;  %v1166_v55 = vld [vmem:[%s1965_s4 + $0xe8] sm:$0xff] }
 0x6a2   : > { %v1085_v0 = vadd.f32 %v1392_v60, %v1078_v61  ;;  %v1667_v8 = vpack.c.bf16 %v1166_v55, %v1165_v53 }
 0x6a3   : > { %v1084_v1 = vadd.f32 %v1392_v60, %v1077_v63 }
 0x6a4   : > { %v1087_v2 = vmax.f32 %v1085_v0, 0.0 }
 0x6a5   : > { %v1086_v38 = vmax.f32 %v1084_v1, 0.0 }
 0x6a7   : > { %v1661_v5 = vpack.c.bf16 %v1087_v2, %v1086_v38 }
 0x6a9   : > { %1662 = vmatpush3.bf16.msra.mxu0 %v1661_v5 }
 0x6aa   : > { %1663 = vmatprep.subr.bf16.mxu0 %v1709_v59 }
 0x6ac   : > { %1567 = vmatmul.mubr.msk.f32.vlgmr.msra.gmra.mrb[6].mxu0 %vm435_vm9, %v1090_v6 }
 0x6ad   : > { %1665 = vmatpush3.bf16.msra.mxu0 %v1664_v7  ;;  %1585 = vmatprep.mubr.msk.f32.mxu0 %vm1710_vm14, %v1706_v10  ;;  %v1170_v10 = vld [vmem:[%s1965_s4 + $0x108] sm:$0xff] }
 0x6ae   : > { %1666 = vmatprep.subr.bf16.mxu0 %v1709_v59  ;;  %v1673_v15 = vpack.c.bf16 %v1170_v10, %v1169_v14 }
 0x6b1   : > { %1668 = vmatpush3.bf16.msra.mxu0 %v1667_v8 }
 0x6b2   : > { %1669 = vmatprep.subr.bf16.mxu0 %v1709_v59 }
 0x6b5   : > { %1671 = vmatpush3.bf16.msra.mxu0 %v1670_v13 }
 0x6b6   : > { %1672 = vmatprep.subr.bf16.mxu0 %v1709_v59 }
 0x6b9   : > { %1674 = vmatpush3.bf16.msra.mxu0 %v1673_v15 }
 0x77f   : > { %v1159_v16 = vpop.f32.mrb[6].mxu0 }
 0x780   : > { %v1568_v17 = vpop.f32.mrb[7].mxu0  ;;  %1586 = vmatmul.mubr.msk.f32.vlgmr.msra.gmra.mrb[8].mxu0 %vm558_vm10, %v1159_v16 }
 0x853   : > { %v1245_v19 = vpop.f32.mrb[8].mxu0 }
 0x854   : > { %v1246_v20 = vadd.f32 %v1394_v18, %v1245_v19  ;;  %v1587_v21 = vpop.f32.mrb[9].mxu0 }
 0x856   : > { %v1249_v23 = vmax.f32 %v1246_v20, 0.0 }
 0x858   : > { %v1255_v24 = vmul.f32 %v1396_v22, %v1249_v23 }
 0x85a   : > { %v1257_v25 = vsel %vm1256_vm15, %v1255_v24, 0.0 }
 0x85b   : > { %1258 = vadd.xlane.f32.xlu0 %v1257_v25 }
 0x8e8   : > { %v1259_v27 = vpop.xlane.xlu0 %1258 }
 0x8e9   : > { %v1265_v28 = vadd.f32 %v1397_v26, %v1259_v27 }
 0x8eb   : > { %1267 = vst.msk [vmem:[%s297_s11] sm:$0xf] %vm1266_vm0, %v1265_v28 }
 0x8ec PF: > { %s16_s21 = sadd.s32 1, %s1703_s21  }
 0x8ed   : > { %p13_p4 = scmp.ge.s32.totalorder %s16_s21, 10  }
 0x8ef   :  { %15 = sbr.rel (!%p13_p4) target bundleno = 1 (0x1), region = 83 }

</bundles_post_ra>
